<compile_context>
chip_gen: v5e
topology: v5e:2x2
jax: 0.10.0
libtpu: 0.0.40
codegen_flags: <defaults>
</compile_context>

<pallas_src>
import jax
import jax.numpy as jnp
from jax.experimental import pallas as pl
from jax.experimental.pallas import tpu as pltpu


_LANES = 512                    # lane-dense slab width -> unmasked full-width vst
_BLOCK_ROWS = 1024              # 1024 x 512 x 4 B = 2 MiB per block per array
_SINGLE_BLOCK_MAX_BYTES = 2 * 1024 * 1024   # below this, skip the grid machinery


def _straight_line_kernel(ab_ref, x_ref, o_ref):
    # ab_ref lives in SMEM: ab_ref[0] = alpha, ab_ref[1] = beta.
    o_ref[...] = ab_ref[0] + ab_ref[1] * x_ref[...]


def _small_path(ab, slab):
    """Single block, no grid: whole (rows, _LANES) slab resident in VMEM."""
    return pl.pallas_call(
        _straight_line_kernel,
        out_shape=jax.ShapeDtypeStruct(slab.shape, slab.dtype),
        in_specs=[
            pl.BlockSpec(memory_space=pltpu.MemorySpace.SMEM),   # alpha/beta
            pl.BlockSpec(memory_space=pltpu.MemorySpace.VMEM),   # whole x slab
        ],
        out_specs=pl.BlockSpec(memory_space=pltpu.MemorySpace.VMEM),
    )(ab, slab)


def _gridded_path(ab, slab):
    """1-D grid over rows, pipelined 2 MiB blocks, scalars via SMEM prefetch.

    The grid uses cdiv, so the final (partial) row block is bounds-masked by
    Pallas; no whole-array padding is required.
    """
    rows = slab.shape[0]
    grid = (pl.cdiv(rows, _BLOCK_ROWS),)
    return pl.pallas_call(
        _straight_line_kernel,
        out_shape=jax.ShapeDtypeStruct(slab.shape, slab.dtype),
        grid_spec=pltpu.PrefetchScalarGridSpec(
            num_scalar_prefetch=1,
            grid=grid,
            in_specs=[
                pl.BlockSpec((_BLOCK_ROWS, _LANES), lambda i, ab_ref: (i, 0)),
            ],
            out_specs=pl.BlockSpec((_BLOCK_ROWS, _LANES), lambda i, ab_ref: (i, 0)),
        ),
        compiler_params=pltpu.CompilerParams(
            dimension_semantics=("parallel",)),   # lets v7x shard rows over 2 TCs
    )(ab, slab)


def straight_line(x, alpha, beta):
    """y = alpha + beta * x via a Pallas TPU kernel (any float32 shape)."""
    orig_shape = x.shape
    dtype = x.dtype
    n = x.size

    ab = jnp.stack([jnp.asarray(alpha, dtype), jnp.asarray(beta, dtype)])
    flat = x.reshape(-1)

    # Pad only to the lane grain (<= _LANES-1 elems); the grid path masks the
    # partial last row-block itself, so no block-grain padding is needed.
    pad = (-n) % _LANES
    if pad:
        flat = jnp.pad(flat, (0, pad))
    slab = flat.reshape(-1, _LANES)

    n_bytes = n * flat.dtype.itemsize
    if n_bytes <= _SINGLE_BLOCK_MAX_BYTES:
        out = _small_path(ab, slab)
    else:
        out = _gridded_path(ab, slab)

    out_flat = out.reshape(-1)
    if pad:
        out_flat = out_flat[:n]
    return out_flat.reshape(orig_shape)


if __name__ == "__main__":
    key = jax.random.PRNGKey(0)
    # Deterministic parameters matching nn.Parameter(torch.tensor(1.0)) init.
    alpha = jnp.float32(1.0)
    beta = jnp.float32(1.0)

    fn = jax.jit(straight_line)

    # Small case consistent with the module: exercises the grid-less path.
    x = jax.random.normal(key, (2, 4, 16, 16), dtype=jnp.float32)
    y = jax.block_until_ready(fn(x, alpha, beta))
    y_ref = alpha + beta * x
    assert y.shape == x.shape
    assert jnp.allclose(y, y_ref, atol=1e-6), "small-path mismatch vs reference"

    # Larger case (non-block-multiple row count) exercises the gridded,
    # pipelined path with the masked partial last block (no full-array pad).
    x_big = jax.random.normal(jax.random.PRNGKey(1), (8, 32, 64, 65),
                              dtype=jnp.float32)
    y_big = jax.block_until_ready(fn(x_big, alpha, beta))
    y_big_ref = alpha + beta * x_big
    assert y_big.shape == x_big.shape
    assert jnp.allclose(y_big, y_big_ref, atol=1e-6), "grid-path mismatch vs reference"

    # Non-lane-multiple element count exercises the small pad/slice path.
    x_odd = jax.random.normal(jax.random.PRNGKey(2), (3, 7, 11), dtype=jnp.float32)
    y_odd = jax.block_until_ready(fn(x_odd, alpha, beta))
    assert jnp.allclose(y_odd, alpha + beta * x_odd, atol=1e-6), "odd-path mismatch"

    print("KERNEL_OK")
</pallas_src>

<mosaic_0001>
module attributes {stable_mosaic.version = 11 : i64} {
  func.func @_straight_line_kernel(%arg0: memref<2xf32, #tpu.memory_space<smem>>, %arg1: memref<4x512xf32, #tpu.memory_space<vmem>>, %arg2: memref<4x512xf32, #tpu.memory_space<vmem>>) attributes {dimension_semantics = [], scalar_prefetch = 0 : i64, scratch_operands = 0 : i64, tpu.core_type = #tpu.core_type<tc>} {
    %c0 = arith.constant 0 : index
    %0 = memref.load %arg0[%c0] : memref<2xf32, #tpu.memory_space<smem>>
    %c1 = arith.constant 1 : index
    %1 = memref.load %arg0[%c1] : memref<2xf32, #tpu.memory_space<smem>>
    %c0_0 = arith.constant 0 : index
    %c0_1 = arith.constant 0 : index
    %2 = vector.load %arg1[%c0_0, %c0_1] : memref<4x512xf32, #tpu.memory_space<vmem>>, vector<4x512xf32>
    %3 = vector.broadcast %1 : f32 to vector<4x512xf32>
    %4 = arith.mulf %3, %2 : vector<4x512xf32>
    %5 = vector.broadcast %0 : f32 to vector<4x512xf32>
    %6 = arith.addf %5, %4 : vector<4x512xf32>
    %c0_2 = arith.constant 0 : index
    %c0_3 = arith.constant 0 : index
    %7 = vector.load %arg2[%c0_2, %c0_3] : memref<4x512xf32, #tpu.memory_space<vmem>>, vector<4x512xf32>
    tpu.vector_store %arg2[%c0_2, %c0_3], %6 {strides = array<i32>} : memref<4x512xf32, #tpu.memory_space<vmem>>, vector<4x512xf32>,
    return
  }
}

</mosaic_0001>

<bundles_post_ra>
// kernel: straight_line.1
= control target key start
LH: loop header
LB: loop body
LE: loop exit
PB: predicated region body
PF: predicated region fallthrough
CT: control target
= control target key end

     0   :  { %7 = vsyncpa [#allocation3], 0  ;;  %s57_s12 = smov [#allocation2]   ;;  %s88_s0 = inlined_call_operand.vmem [shape: f32[2], index: 0, kind: input, shape index: {}]   ;;  %s89_s1 = inlined_call_operand.vmem [shape: f32[4,512], index: 1, kind: input, shape index: {}]   ;;  %s90_s2 = inlined_call_operand.vmem [shape: f32[4,512], index: 2, kind: output, shape index: {}]  }
   0x1   :  { %s13_s11 = sshll.u32 %s88_s0, 4  ;;  %s14_s11 = int_to_ptr.vmem [resolvable:$true] %s13_s11 }
   0x2   :  { %16 = dma.vmem_to_smem %s14_s11, 16, %s57_s12, [#allocation3]  }
   0x3   :  { %55 = dma.done.wait [#allocation3], 16  }
   0x4   :  { %56 = vsyncadd [#allocation3], 4294967280 }
   0x5   :  { %23 = sfence }
   0x6   :  { %s24_s13 = sld [smem:[#allocation2]]  ;;  %v26_v0 = vld [vmem:[%s89_s1] sm:$0xff]  ;;  %v27_v1 = vld [vmem:[%s89_s1 + $0x8] sm:$0xff] }
   0x7   :  { %s41_s14 = sld [smem:[#allocation2 + $0x1]] }
   0xc   :  { %v31_v3 = vstv %s24_s13 }
   0xd   :  { %v28_v2 = vstv %s41_s14 }
   0xe   :  { %v29_v4 = vmul.f32 %v28_v2, %v26_v0  ;;  %v30_v5 = vmul.f32 %v28_v2, %v27_v1 }
  0x10   :  { %v32_v6 = vadd.f32 %v31_v3, %v29_v4  ;;  %v33_v7 = vadd.f32 %v31_v3, %v30_v5 }
  0x12   :  { %34 = vst [vmem:[%s90_s2] sm:$0xff] %v32_v6 }
  0x13   :  { %35 = vst [vmem:[%s90_s2 + $0x8] sm:$0xff] %v33_v7 }
  0x14   :  { %40 = vsyncpa [#allocation3], 1 }

</bundles_post_ra>
